<compile_context>
chip_gen: v7x
topology: tpu7x:2x2x1
jax: 0.10.0
libtpu: 0.0.40
codegen_flags: <defaults>
</compile_context>

<pallas_src>
import functools

import jax
import jax.numpy as jnp
import numpy as np
from jax.experimental import pallas as pl
from jax.experimental.pallas import tpu as pltpu


def _rope_kernel(pos_ref, inv_ref, cos_ref, sin_ref, *, scaling, packed):
    # pos_ref: (B, T, 1) int32  (positions on the sublane axis -> no relayout)
    # inv_ref: (1, 1, dim) f32  (inv_freq duplicated: inv_full[d] = inv[d % half])
    inv = inv_ref[...]                                   # (1, 1, dim)
    dim = inv.shape[-1]

    if packed:
        # Pack two positions per vreg row: lanes [0:half) use positions from the
        # first half of the tile, lanes [half:dim) use positions from the second
        # half.  sin/cos then run on half the vregs (they are the VALU-bound
        # part); the duplicated output layout is rebuilt with an XLU roll +
        # selects and stored with two contiguous full-width stores.
        B = pos_ref.shape[0]
        T = pos_ref.shape[1]
        T2 = T // 2
        half = dim // 2

        pos_a = pos_ref[:, :T2, :].astype(jnp.float32)   # (B, T2, 1)
        pos_b = pos_ref[:, T2:, :].astype(jnp.float32)   # (B, T2, 1)

        lane = jax.lax.broadcasted_iota(jnp.int32, (B, T2, dim), 2)
        lo = lane < half                                  # (B, T2, dim) bool

        pos_sel = jnp.where(lo, pos_a, pos_b)            # (B, T2, dim)
        emb = pos_sel * inv                               # (B, T2, dim) f32

        c = jnp.cos(emb)
        s = jnp.sin(emb)
        if scaling != 1.0:  # static Python float -> branch resolved at trace time
            c = c * scaling
            s = s * scaling

        # Swap the two lane-halves (XLU, off the saturated VALU slot).
        c_sw = pltpu.roll(c, shift=half, axis=2)
        s_sw = pltpu.roll(s, shift=half, axis=2)

        # Rows [0, T2): duplicate the pos_a half;  rows [T2, T): duplicate pos_b.
        cos_ref[:, :T2, :] = jnp.where(lo, c, c_sw).astype(cos_ref.dtype)
        cos_ref[:, T2:, :] = jnp.where(lo, c_sw, c).astype(cos_ref.dtype)
        sin_ref[:, :T2, :] = jnp.where(lo, s, s_sw).astype(sin_ref.dtype)
        sin_ref[:, T2:, :] = jnp.where(lo, s_sw, s).astype(sin_ref.dtype)
    else:
        # Simple lane-dense path (small/odd shapes): emb = pos * inv_full is
        # exactly cat([freqs, freqs], -1); one full-width store per output.
        pos = pos_ref[...].astype(jnp.float32)            # (B, T, 1)
        emb = pos * inv                                    # (B, T, dim)
        c = jnp.cos(emb)
        s = jnp.sin(emb)
        if scaling != 1.0:
            c = c * scaling
            s = s * scaling
        cos_ref[...] = c.astype(cos_ref.dtype)
        sin_ref[...] = s.astype(sin_ref.dtype)


def qwen2_rotary_embedding(x, position_ids, inv_freq, attention_scaling=1.0,
                           *, max_tile_s=None):
    """x: any float array (only dtype used); position_ids: (B, S) int32;
    inv_freq: (half,) f32.  Returns (cos, sin), each (B, S, 2*half) in x.dtype."""
    B, S = position_ids.shape
    half = inv_freq.shape[0]
    dim = 2 * half
    out_dtype = x.dtype
    out_itemsize = np.dtype(out_dtype).itemsize

    # inv duplicated so emb = pos * inv_full == cat([freqs, freqs], -1).
    inv_full = jnp.concatenate([inv_freq, inv_freq]).astype(jnp.float32).reshape(1, 1, dim)
    # Pre-shape positions (B, S, 1): positions land on the sublane axis, so the
    # kernel only needs a (free) lane broadcast, never a lane->sublane relayout.
    pos3 = position_ids.astype(jnp.int32).reshape(B, S, 1)

    # ---- tile-size policy ----------------------------------------------------
    if S <= 128:
        tile_s = S                      # single small block; nothing to pipeline
    else:
        # Per-step VMEM (both pipeline buffers + f32 temporaries), conservative:
        #   outputs:  2 arrays x 2 buffers x B*tile*dim*itemsize
        #   pos:      2 buffers x B*tile*128*4   (lane-padded (B, tile, 1) int32)
        #   temps:    ~3 live f32 arrays of B*tile*dim (emb / cos / sin scale)
        budget = 12 * 1024 * 1024       # stays under v5e's 16 MiB scoped default
        per_row = B * (4 * dim * out_itemsize + 2 * 128 * 4 + 3 * dim * 4)
        vmem_cap = max(budget // per_row, 128)
        target = pl.cdiv(S, 4)          # aim for >= 4 grid steps (>= 2 guaranteed)
        tile_s = min(512, vmem_cap, max(128, target))
        tile_s = max(128, (tile_s // 128) * 128)
        if max_tile_s is not None:
            tile_s = min(tile_s, max(128, (max_tile_s // 128) * 128))
    grid = (pl.cdiv(S, tile_s),)

    # Packed (half-dim trig) path needs an even split of the tile into 8-row
    # groups and a clean 128-lane layout; otherwise fall back to the simple path.
    packed = (tile_s % 16 == 0) and (dim % 128 == 0)

    kernel = functools.partial(_rope_kernel,
                               scaling=float(attention_scaling),
                               packed=packed)

    cost = pl.CostEstimate(
        flops=6 * B * S * dim,
        transcendentals=(B * S * dim) if packed else (2 * B * S * dim),
        bytes_accessed=B * S * 4 + dim * 4 + 2 * B * S * dim * out_itemsize,
    )

    cos, sin = pl.pallas_call(
        kernel,
        out_shape=(
            jax.ShapeDtypeStruct((B, S, dim), out_dtype),
            jax.ShapeDtypeStruct((B, S, dim), out_dtype),
        ),
        grid=grid,
        in_specs=[
            pl.BlockSpec((B, tile_s, 1), lambda i: (0, i, 0)),
            pl.BlockSpec((1, 1, dim), lambda i: (0, 0, 0)),
        ],
        out_specs=(
            pl.BlockSpec((B, tile_s, dim), lambda i: (0, i, 0)),
            pl.BlockSpec((B, tile_s, dim), lambda i: (0, i, 0)),
        ),
        # TODO(synk): on v7x, verify the single "parallel" axis shards across
        # both TensorCores; if not, switch to pltpu.CORE_PARALLEL / core_map.
        compiler_params=pltpu.CompilerParams(dimension_semantics=("parallel",)),
        cost_estimate=cost,
    )(pos3, inv_full)
    return cos, sin


def _reference(x, position_ids, inv_freq, attention_scaling):
    # Pure-JAX reference mirroring the PyTorch forward.
    freqs = position_ids.astype(jnp.float32)[:, :, None] * inv_freq[None, None, :]
    emb = jnp.concatenate([freqs, freqs], axis=-1)
    cos = jnp.cos(emb) * attention_scaling
    sin = jnp.sin(emb) * attention_scaling
    return cos.astype(x.dtype), sin.astype(x.dtype)


def _run_case(key, B, S, head_dim, hidden, rope_theta, attention_scaling,
              max_tile_s=None):
    k_x, k_pos = jax.random.split(key)
    inv_freq = 1.0 / (
        rope_theta ** (jnp.arange(0, head_dim, 2, dtype=jnp.float32) / head_dim)
    )  # (head_dim // 2,)
    x = jax.random.normal(k_x, (B, S, hidden), dtype=jnp.float32)
    position_ids = jax.random.randint(k_pos, (B, S), 0, 1024, dtype=jnp.int32)

    cos, sin = qwen2_rotary_embedding(
        x, position_ids, inv_freq, attention_scaling, max_tile_s=max_tile_s
    )
    jax.block_until_ready((cos, sin))

    cos_ref, sin_ref = _reference(x, position_ids, inv_freq, attention_scaling)
    # Loose-ish atol: for large angles (pos*inv up to ~1e3 rad) the f32
    # range-reduction inside cos/sin may differ by a few ulp between the Mosaic
    # and XLA implementations; values themselves are bounded by |scaling|.
    np.testing.assert_allclose(np.asarray(cos), np.asarray(cos_ref),
                               rtol=1e-5, atol=1e-4)
    np.testing.assert_allclose(np.asarray(sin), np.asarray(sin_ref),
                               rtol=1e-5, atol=1e-4)


if __name__ == "__main__":
    key = jax.random.PRNGKey(0)
    k1, k2, k3 = jax.random.split(key, 3)

    # Case 1: tiny config (head_dim=32 -> dim=32 < 128): single-block simple
    # path, default rope scaling (the ==1.0 multiply statically skipped).
    _run_case(k1, B=2, S=8, head_dim=32, hidden=64,
              rope_theta=1_000_000.0, attention_scaling=1.0)

    # Case 2: real Qwen2 head_dim=128: packed half-dim trig path, 4-step
    # pipelined grid (tile_s=128 -> grid=(4,)), non-trivial attention_scaling.
    _run_case(k2, B=2, S=512, head_dim=128, hidden=128,
              rope_theta=1_000_000.0, attention_scaling=0.75, max_tile_s=128)

    # Case 3: ragged sequence (S % tile_s != 0) exercises the masked writeback
    # of the final partial block on the packed path.
    _run_case(k3, B=1, S=200, head_dim=128, hidden=128,
              rope_theta=1_000_000.0, attention_scaling=1.0)

    print("KERNEL_OK")
</pallas_src>

<mosaic_0001>
module attributes {stable_mosaic.version = 11 : i64} {
  func.func @_rope_kernel(%arg0: i32, %arg1: memref<2x8x1xi32, #tpu.memory_space<vmem>>, %arg2: memref<1x1x32xf32, #tpu.memory_space<vmem>>, %arg3: memref<2x8x32xf32, #tpu.memory_space<vmem>>, %arg4: memref<2x8x32xf32, #tpu.memory_space<vmem>>) attributes {dimension_semantics = [#tpu.dimension_semantics<parallel>], iteration_bounds = array<i64: 1>, scalar_prefetch = 0 : i64, scratch_operands = 0 : i64, tpu.core_type = #tpu.core_type<tc>, window_params = [{transform_indices = @transform_0, window_bounds = array<i64: 2, 8, 1>}, {pipeline_mode = #tpu.pipeline_mode<synchronous>, transform_indices = @transform_1, window_bounds = array<i64: 1, 1, 32>}, {transform_indices = @transform_2, window_bounds = array<i64: 2, 8, 32>}, {transform_indices = @transform_3, window_bounds = array<i64: 2, 8, 32>}]} {
    %c0 = arith.constant 0 : index
    %c0_0 = arith.constant 0 : index
    %c0_1 = arith.constant 0 : index
    %0 = vector.load %arg2[%c0, %c0_0, %c0_1] : memref<1x1x32xf32, #tpu.memory_space<vmem>>, vector<1x1x32xf32>
    %c0_2 = arith.constant 0 : index
    %c0_3 = arith.constant 0 : index
    %c0_4 = arith.constant 0 : index
    %1 = vector.load %arg1[%c0_2, %c0_3, %c0_4] : memref<2x8x1xi32, #tpu.memory_space<vmem>>, vector<2x8x1xi32>
    %2 = arith.sitofp %1 : vector<2x8x1xi32> to vector<2x8x1xf32>
    %3 = vector.broadcast %2 : vector<2x8x1xf32> to vector<2x8x32xf32>
    %4 = vector.broadcast %0 : vector<1x1x32xf32> to vector<2x8x32xf32>
    %5 = arith.mulf %3, %4 : vector<2x8x32xf32>
    %6 = math.cos %5 : vector<2x8x32xf32>
    %7 = math.sin %5 : vector<2x8x32xf32>
    %c0_5 = arith.constant 0 : index
    %c0_6 = arith.constant 0 : index
    %c0_7 = arith.constant 0 : index
    %8 = vector.load %arg3[%c0_5, %c0_6, %c0_7] : memref<2x8x32xf32, #tpu.memory_space<vmem>>, vector<2x8x32xf32>
    tpu.vector_store %arg3[%c0_5, %c0_6, %c0_7], %6 {strides = array<i32>} : memref<2x8x32xf32, #tpu.memory_space<vmem>>, vector<2x8x32xf32>,
    %c0_8 = arith.constant 0 : index
    %c0_9 = arith.constant 0 : index
    %c0_10 = arith.constant 0 : index
    %9 = vector.load %arg4[%c0_8, %c0_9, %c0_10] : memref<2x8x32xf32, #tpu.memory_space<vmem>>, vector<2x8x32xf32>
    tpu.vector_store %arg4[%c0_8, %c0_9, %c0_10], %7 {strides = array<i32>} : memref<2x8x32xf32, #tpu.memory_space<vmem>>, vector<2x8x32xf32>,
    return
  }
  func.func @transform_0(%arg0: i32) -> (i32, i32, i32) {
    %c0_i32 = arith.constant 0 : i32
    %c0_i32_0 = arith.constant 0 : i32
    %c0_i32_1 = arith.constant 0 : i32
    return %c0_i32, %arg0, %c0_i32_0 : i32, i32, i32
  }
  func.func @transform_1(%arg0: i32) -> (i32, i32, i32) {
    %c0_i32 = arith.constant 0 : i32
    %c0_i32_0 = arith.constant 0 : i32
    %c0_i32_1 = arith.constant 0 : i32
    %c0_i32_2 = arith.constant 0 : i32
    return %c0_i32, %c0_i32_0, %c0_i32_1 : i32, i32, i32
  }
  func.func @transform_2(%arg0: i32) -> (i32, i32, i32) {
    %c0_i32 = arith.constant 0 : i32
    %c0_i32_0 = arith.constant 0 : i32
    %c0_i32_1 = arith.constant 0 : i32
    return %c0_i32, %arg0, %c0_i32_0 : i32, i32, i32
  }
  func.func @transform_3(%arg0: i32) -> (i32, i32, i32) {
    %c0_i32 = arith.constant 0 : i32
    %c0_i32_0 = arith.constant 0 : i32
    %c0_i32_1 = arith.constant 0 : i32
    return %c0_i32, %arg0, %c0_i32_0 : i32, i32, i32
  }
}

</mosaic_0001>

<bundles_post_ra>
// kernel: tpu_custom_call.1
= control target key start
LH: loop header
LB: loop body
LE: loop exit
PB: predicated region body
PF: predicated region fallthrough
CT: control target
= control target key end

     0   :  { %9 = vsyncpa [#allocation3], 0  ;;  %v582_v2 = vmov 0   ;;  %s717_s0 = inlined_call_operand.vmem [shape: s32[2,8,1], index: 0, kind: input, shape index: {}]   ;;  %s718_s1 = inlined_call_operand.vmem [shape: f32[1,1,32], index: 1, kind: input, shape index: {}]   ;;  %s719_s2 = inlined_call_operand.hbm [shape: f32[2,8,32], index: 2, kind: output, shape index: {0}]   ;;  %s720_s3 = inlined_call_operand.hbm [shape: f32[2,8,32], index: 3, kind: output, shape index: {1}]  }
   0x1   :  { %v16_v0 = vld [vmem:[%s717_s0] sm:$0xff]  ;;  %v17_v1 = vld [vmem:[%s717_s0 + $0x8] sm:$0xff]  ;;  %525 = vset.pattern.permute.xlu0 %v582_v2 }
   0x2   :  { %v18_v3 = vcvt.s32.f32 %v16_v0 }
   0x3   :  { %10 = vsyncpa [#allocation5], 0  ;;  %v19_v4 = vcvt.s32.f32 %v17_v1  ;;  %v489_v5 = vld [vmem:[%s718_s1] ss:$0 sm:$0xff]  ;;  %v583_v26 = vmov 683565275  }
   0x4   :  { %22 = vperm.xlu0 %525, %v18_v3   ;;  %v584_v30 = vmov 2475754826   ;;  %v585_v32 = vmov 2131351028   ;;  %v586_v34 = vmov 2102212464  }
   0x5   :  { %v587_v36 = vmov 920167782   ;;  %v588_v43 = vmov 1326507024   ;;  %s589_s0 = smov [#allocation2]   ;;  %s590_s18 = smov [#allocation4]  }
   0x6   :  { %s462_s1 = sshll.u32 %s589_s0, 4  ;;  %s474_s19 = sshll.u32 %s590_s18, 4  ;;  %s463_s1 = int_to_ptr.vmem [resolvable:$true] %s462_s1  ;;  %s684_s19 = int_to_ptr.vmem [resolvable:$true] %s474_s19 }
   0x7   :  { %s534_s20 = scalar_lea.vmem %s463_s1, 256  ;;  %p539_p1 = scmp.lt.s32.totalorder %s463_s1, %s463_s1 }
   0x8   :  { %27 = vperm.xlu0 %525, %v19_v4   ;;  %p535_p0 = scmp.ne.s32.totalorder %s463_s1, %s534_s20  ;;  %p540_p2 = scmp.lt.s32.totalorder %s534_s20, %s534_s20 }
   0xa   :  { %p541_p3 = por %p540_p2, %p539_p1 }
   0xc   :  { %p542_p4 = pnand %p541_p3, %p535_p0 }
  0x83   :  { %v23_v6 = vpop.permute.xlu0 %22 }
  0x84   :  { %v622_v7 = vmul.f32 %v489_v5, %v23_v6 }
  0x86   :  { %v38_v8 = vand.u32 2147483647, %v622_v7  ;;  %v41_v9 = vand.u32 2139095040, %v622_v7  ;;  %vm40_vm14 = vcmp.lt.s32.totalorder %v622_v7, 0 }
  0x87   :  { %v28_v10 = vpop.permute.xlu0 %27 }
  0x88   :  { %v42_v11 = vshrl.u32 %v41_v9, 23  ;;  %v626_v12 = vmul.f32 %v489_v5, %v28_v10  ;;  %v45_v13 = vand.u32 8388607, %v38_v8  ;;  %vm39_vm15 = vcmp.le.f32.partialorder %v38_v8, 0.7853982 }
  0x8a   :  { %v490_v14 = vadd.s32 4294967169, %v42_v11  ;;  %v144_v15 = vand.u32 2139095040, %v626_v12  ;;  %v46_v17 = vor.u32 8388608, %v45_v13  ;;  %v141_v19 = vand.u32 2147483647, %v626_v12 }
  0x8c   :  { %v48_v16 = vadd.s32 1, %v490_v14  ;;  %v145_v18 = vshrl.u32 %v144_v15, 23  ;;  %v632_v24 = vshll.u32 %v46_v17, 8  ;;  %v148_v28 = vand.u32 8388607, %v141_v19 }
  0x8e   :  { %vm49_vm0 = vcmp.gt.s32.totalorder %v48_v16, 0  ;;  %v494_v21 = vadd.s32 4294967169, %v145_v18  ;;  %v149_v58 = vor.u32 8388608, %v148_v28 }
  0x8f   :  { %v50_v20 = vsel %vm49_vm0, %v48_v16, 0  ;;  %vm143_vm0 = vcmp.lt.s32.totalorder %v626_v12, 0 }
  0x90   :  { %v51_v22 = vshrl.u32 %v50_v20, 5  ;;  %v52_v23 = vand.u32 31, %v50_v20  ;;  %v151_v29 = vadd.s32 1, %v494_v21  ;;  %v189_v9 = vshll.u32 %v149_v58, 8 }
  0x92   :  { %v53_v25 = vsub.s32 32, %v52_v23  ;;  %v55_v27 = vshll.u32 %v583_v26, %v52_v23  ;;  %v58_v31 = vshll.u32 %v584_v30, %v52_v23  ;;  %v61_v33 = vshll.u32 %v585_v32, %v52_v23 }
  0x93   :  { %v64_v35 = vshll.u32 %v586_v34, %v52_v23  ;;  %v67_v37 = vshll.u32 %v587_v36, %v52_v23  ;;  %vm70_vm1 = vcmp.lt.s32.totalorder %v51_v22, 1  ;;  %vm72_vm2 = vcmp.lt.s32.totalorder %v51_v22, 3 }
  0x94   :  { %v56_v38 = vshrl.u32 %v584_v30, %v53_v25  ;;  %v59_v39 = vshrl.u32 %v585_v32, %v53_v25  ;;  %v62_v40 = vshrl.u32 %v586_v34, %v53_v25  ;;  %v54_v41 = vshrl.u32 %v583_v26, %v53_v25 }
  0x95   :  { %v65_v42 = vshrl.u32 %v587_v36, %v53_v25  ;;  %v68_v44 = vshrl.u32 %v588_v43, %v53_v25  ;;  %vm152_vm3 = vcmp.gt.s32.totalorder %v151_v29, 0  ;;  %vm73_vm4 = vcmp.lt.s32.totalorder %v51_v22, 4 }
  0x96   :  { %v57_v45 = vor.u32 %v56_v38, %v55_v27  ;;  %v60_v46 = vor.u32 %v59_v39, %v58_v31  ;;  %v63_v47 = vor.u32 %v62_v40, %v61_v33  ;;  %v153_v50 = vsel %vm152_vm3, %v151_v29, 0 }
  0x97   :  { %v66_v48 = vor.u32 %v65_v42, %v64_v35  ;;  %v69_v49 = vor.u32 %v68_v44, %v67_v37  ;;  %vm71_vm5 = vcmp.lt.s32.totalorder %v51_v22, 2  ;;  %v155_v61 = vand.u32 31, %v153_v50 }
  0x98   :  { %v74_v51 = vsel %vm70_vm1, %v54_v41, %v57_v45  ;;  %v75_v52 = vsel %vm73_vm4, %v63_v47, 2102212464  ;;  %v78_v53 = vsel %vm70_vm1, %v57_v45, %v60_v46  ;;  %v82_v54 = vsel %vm70_vm1, %v60_v46, %v63_v47 }
  0x99   :  { %v76_v55 = vsel %vm72_vm2, %v60_v46, %v75_v52  ;;  %v79_v56 = vsel %vm73_vm4, %v66_v48, 920167782  ;;  %v83_v57 = vsel %vm73_vm4, %v69_v49, 1326507024  ;;  %v154_v5 = vshrl.u32 %v153_v50, 5 }
  0x9a   :  { %v80_v59 = vsel %vm72_vm2, %v63_v47, %v79_v56  ;;  %v84_v60 = vsel %vm72_vm2, %v66_v48, %v83_v57  ;;  %v77_v62 = vsel %vm71_vm5, %v74_v51, %v76_v55  ;;  %v156_v6 = vsub.s32 32, %v155_v61 }
  0x9b   :  { %v81_v63 = vsel %vm71_vm5, %v78_v53, %v80_v59  ;;  %v85_v0 = vsel %vm71_vm5, %v82_v54, %v84_v60  ;;  %v93_v10 = vmul.u32 %v632_v24, %v77_v62  ;;  %v158_v11 = vshll.u32 %v583_v26, %v155_v61 }
  0x9c   :  { %v645_v1 = vmul.u32.u64.low %v632_v24, %v85_v0  ;;  %v646_v2 = vmul.u32.u64.high %v632_v24, %v85_v0, %v645_v1  ;;  %v649_v3 = vmul.u32.u64.low %v632_v24, %v81_v63  ;;  %v650_v4 = vmul.u32.u64.high %v632_v24, %v81_v63, %v649_v3 }
  0x9d   :  { %v161_v13 = vshll.u32 %v584_v30, %v155_v61  ;;  %v164_v14 = vshll.u32 %v585_v32, %v155_v61  ;;  %v159_v15 = vshrl.u32 %v584_v30, %v156_v6  ;;  %v162_v16 = vshrl.u32 %v585_v32, %v156_v6 }
  0x9e   :  { %v165_v17 = vshrl.u32 %v586_v34, %v156_v6  ;;  %v167_v18 = vshll.u32 %v586_v34, %v155_v61  ;;  %vm95_vm6 = vc.u32 %v646_v2, %v649_v3  ;;  %v96_v20 = vadd.s32 1, %v650_v4 }
  0x9f   :  { %v168_v21 = vshrl.u32 %v587_v36, %v156_v6  ;;  %v170_v22 = vshll.u32 %v587_v36, %v155_v61  ;;  %v160_v23 = vor.u32 %v159_v15, %v158_v11  ;;  %v163_v25 = vor.u32 %v162_v16, %v161_v13 }
  0xa0   :  { %v166_v27 = vor.u32 %v165_v17, %v164_v14  ;;  %v171_v28 = vshrl.u32 %v588_v43, %v156_v6  ;;  %v97_v24 = vsel %vm95_vm6, %v96_v20, %v650_v4  ;;  %vm173_vm7 = vcmp.lt.s32.totalorder %v154_v5, 1 }
  0xa1   :  { %v169_v29 = vor.u32 %v168_v21, %v167_v18  ;;  %vm176_vm8 = vcmp.lt.s32.totalorder %v154_v5, 4  ;;  %v98_v30 = vadd.s32 %v97_v24, %v93_v10  ;;  %vm175_vm9 = vcmp.lt.s32.totalorder %v154_v5, 3 }
  0xa2   :  { %v172_v31 = vor.u32 %v171_v28, %v170_v22  ;;  %v178_v32 = vsel %vm176_vm8, %v166_v27, 2102212464  ;;  %v157_v33 = vshrl.u32 %v583_v26, %v156_v6  ;;  %v181_v34 = vsel %vm173_vm7, %v160_v23, %v163_v25 }
  0xa3   :  { %v182_v35 = vsel %vm176_vm8, %v169_v29, 920167782  ;;  %v185_v37 = vsel %vm173_vm7, %v163_v25, %v166_v27  ;;  %v99_v38 = vadd.s32 536870912, %v98_v30  ;;  %vm174_vm10 = vcmp.lt.s32.totalorder %v154_v5, 2 }
  0xa4   :  { %v183_v36 = vsel %vm175_vm9, %v166_v27, %v182_v35  ;;  %v186_v39 = vsel %vm176_vm8, %v172_v31, 1326507024  ;;  %v177_v40 = vsel %vm173_vm7, %v157_v33, %v160_v23  ;;  %v179_v41 = vsel %vm175_vm9, %v163_v25, %v178_v32 }
  0xa5   :  { %v184_v42 = vsel %vm174_vm10, %v181_v34, %v183_v36  ;;  %v187_v43 = vsel %vm175_vm9, %v169_v29, %v186_v39  ;;  %v100_v44 = vshrl.u32 %v99_v38, 30  ;;  %v180_v50 = vsel %vm174_vm10, %v177_v40, %v179_v41 }
  0xa6   :  { %v188_v45 = vsel %vm174_vm10, %v185_v37, %v187_v43  ;;  %v660_v46 = vmul.u32.u64.low %v189_v9, %v184_v42  ;;  %v661_v47 = vmul.u32.u64.high %v189_v9, %v184_v42, %v660_v46  ;;  %v196_v53 = vmul.u32 %v189_v9, %v180_v50 }
  0xa7   :  { %v663_v48 = vmul.u32.u64.low %v189_v9, %v188_v45  ;;  %v664_v49 = vmul.u32.u64.high %v189_v9, %v188_v45, %v663_v48  ;;  %v101_v26 = vshll.u32 %v100_v44, 30  ;;  %v94_v1 = vadd.s32 %v649_v3, %v646_v2 }
  0xa8   :  { %v199_v52 = vadd.s32 1, %v661_v47  ;;  %v124_v23 = vsub.s32 4, %v100_v44  ;;  %vm142_vm1 = vcmp.le.f32.partialorder %v141_v19, 0.7853982  ;;  %vm452_vm3 = vcmask 261120  }
  0xa9   :  { %v102_v51 = vsub.s32 %v98_v30, %v101_v26  ;;  %vm198_vm11 = vc.u32 %v664_v49, %v660_v46  ;;  %v197_v2 = vadd.s32 %v660_v46, %v664_v49  ;;  %vm130_vm9 = vweird.f32 %v622_v7 }
  0xaa   :  { %v200_v55 = vsel %vm198_vm11, %v199_v52, %v661_v47  ;;  %v125_v32 = vsel %vm40_vm14, %v124_v23, %v100_v44 }
  0xab   :  { %v104_v54 = vsub.s32 0, %v102_v51  ;;  %v201_v56 = vadd.s32 %v200_v55, %v196_v53  ;;  %v127_v38 = vsel %vm39_vm15, 0, %v125_v32 }
  0xac   :  { %v337_v40 = vadd.s32 3, %v127_v38  ;;  %v131_v45 = vand.u32 3, %v127_v38 }
  0xad   :  { %v491_v57 = vmin.u32 %v104_v54, %v102_v51  ;;  %v202_v58 = vadd.s32 536870912, %v201_v56 }
  0xae   :  { %v338_v8 = vand.u32 3, %v337_v40  ;;  %vm136_vm2 = vcmp.eq.s32.totalorder %v131_v45, 2  ;;  %vm133_vm5 = vcmp.eq.s32.totalorder %v131_v45, 0  ;;  %vm132_vm7 = vcmp.lt.s32.totalorder %v131_v45, 2 }
  0xaf   :  { %v106_v59 = vclz %v491_v57  ;;  %v203_v60 = vshrl.u32 %v202_v58, 30 }
  0xb0   :  { %vm343_vm4 = vcmp.eq.s32.totalorder %v338_v8, 2  ;;  %vm340_vm6 = vcmp.eq.s32.totalorder %v338_v8, 0  ;;  %vm339_vm8 = vcmp.lt.s32.totalorder %v338_v8, 2 }
  0xb1   :  { %v492_v61 = vadd.s32 4294967294, %v106_v59  ;;  %v204_v62 = vshll.u32 %v203_v60, 30  ;;  %v227_v42 = vsub.s32 4, %v203_v60 }
  0xb3   :  { %vm493_vm12 = vcmp.lt.s32.totalorder %v492_v61, 0  ;;  %v205_v0 = vsub.s32 %v201_v56, %v204_v62  ;;  %v228_v46 = vsel %vm143_vm0, %v227_v42, %v203_v60 }
  0xb4   :  { %v109_v63 = vsel %vm493_vm12, 0, %v492_v61 }
  0xb5   :  { %v110_v4 = vsub.s32 32, %v109_v63  ;;  %v114_v5 = vsub.s32 4294967266, %v109_v63  ;;  %v207_v6 = vsub.s32 0, %v205_v0  ;;  %v111_v9 = vshll.u32 %v102_v51, %v109_v63 }
  0xb6   :  { %v230_v51 = vsel %vm142_vm1, 0, %v228_v46 }
  0xb7   :  { %v112_v10 = vshrl.u32 %v94_v1, %v110_v4  ;;  %v115_v11 = vadd.s32 127, %v114_v5  ;;  %v495_v13 = vmin.u32 %v207_v6, %v205_v0  ;;  %v441_v57 = vadd.s32 3, %v230_v51 }
  0xb8   :  { %v234_v60 = vand.u32 3, %v230_v51 }
  0xb9   :  { %v113_v14 = vor.u32 %v112_v10, %v111_v9  ;;  %v116_v15 = vshll.u32 %v115_v11, 23  ;;  %v209_v16 = vclz %v495_v13  ;;  %v442_v61 = vand.u32 3, %v441_v57 }
  0xba   :  { %vm239_vm10 = vcmp.eq.s32.totalorder %v234_v60, 2  ;;  %vm236_vm12 = vcmp.eq.s32.totalorder %v234_v60, 0 }
  0xbb   :  { %v117_v17 = vor.u32 4788187, %v116_v15  ;;  %v496_v18 = vadd.s32 4294967294, %v209_v16  ;;  %v120_v21 = vcvt.s32.f32 %v113_v14  ;;  %vm447_vm11 = vcmp.eq.s32.totalorder %v442_v61, 2 }
  0xbd   :  { %v118_v20 = vand.u32 2147483647, %v117_v17  ;;  %vm497_vm13 = vcmp.lt.s32.totalorder %v496_v18, 0 }
  0xbe   :  { %v212_v25 = vsel %vm497_vm13, 0, %v496_v18  ;;  %vm444_vm13 = vcmp.eq.s32.totalorder %v442_v61, 0 }
  0xbf   :  { %v121_v22 = vmul.f32 %v120_v21, %v118_v20  ;;  %v213_v3 = vsub.s32 32, %v212_v25  ;;  %v217_v27 = vsub.s32 4294967266, %v212_v25  ;;  %v214_v24 = vshll.u32 %v205_v0, %v212_v25 }
  0xc1   :  { %v122_v28 = vxor.u32 2147483648, %v121_v22  ;;  %v215_v29 = vshrl.u32 %v197_v2, %v213_v3  ;;  %v218_v30 = vadd.s32 127, %v217_v27 }
  0xc3   :  { %v123_v31 = vsel %vm40_vm14, %v122_v28, %v121_v22  ;;  %v216_v34 = vor.u32 %v215_v29, %v214_v24  ;;  %v219_v35 = vshll.u32 %v218_v30, 23  ;;  %vm235_vm14 = vcmp.lt.s32.totalorder %v234_v60, 2 }
  0xc4   :  { %v126_v33 = vsel %vm39_vm15, %v622_v7, %v123_v31  ;;  %vm443_vm15 = vcmp.lt.s32.totalorder %v442_v61, 2 }
  0xc5   :  { %526 = vcosq.f32 %v126_v33  ;;  %v220_v37 = vor.u32 4788187, %v219_v35  ;;  %v223_v39 = vcvt.s32.f32 %v216_v34 }
  0xc6   :  { %528 = vsinq.f32 %v126_v33 }
  0xc7   :  { %v221_v36 = vand.u32 2147483647, %v220_v37 }
  0xc9   :  { %v224_v41 = vmul.f32 %v223_v39, %v221_v36 }
  0xcb   :  { %v225_v43 = vxor.u32 2147483648, %v224_v41 }
  0xcd   :  { %v226_v44 = vsel %vm143_vm0, %v225_v43, %v224_v41  ;;  %vm233_vm0 = vweird.f32 %v626_v12 }
  0xce   :  { %v229_v48 = vsel %vm142_vm1, %v626_v12, %v226_v44 }
  0xcf   :  { %v527_v47 = vpop.eup %526  ;;  %530 = vcosq.f32 %v229_v48 }
  0xd0   :  { %v529_v49 = vpop.eup %528  ;;  %v137_v26 = vxor.u32 2147483648, %v527_v47  ;;  %532 = vsinq.f32 %v229_v48 }
  0xd1   :  { %v134_v50 = vxor.u32 2147483648, %v529_v49 }
  0xd2   :  { %v138_v52 = vsel %vm136_vm2, %v137_v26, %v529_v49  ;;  %v345_v53 = vsel %vm343_vm4, %v137_v26, %v529_v49 }
  0xd3   :  { %v135_v19 = vsel %vm133_vm5, %v527_v47, %v134_v50  ;;  %v342_v54 = vsel %vm340_vm6, %v527_v47, %v134_v50 }
  0xd4   :  { %v139_v55 = vsel %vm132_vm7, %v135_v19, %v138_v52  ;;  %v346_v56 = vsel %vm339_vm8, %v342_v54, %v345_v53 }
  0xd5   :  { %v140_v58 = vsel %vm130_vm9, nan, %v139_v55  ;;  %v347_v59 = vsel %vm130_vm9, nan, %v346_v56 }
  0xd6   :  { %453 = vst.msk [vmem:[#allocation2] sm:$0xff] %vm452_vm3, %v140_v58  ;;  %455 = vst.msk [vmem:[#allocation4] sm:$0xff] %vm452_vm3, %v347_v59 }
  0xd9   :  { %v531_v62 = vpop.eup %530 }
  0xda   :  { %v533_v63 = vpop.eup %532  ;;  %v240_v0 = vxor.u32 2147483648, %v531_v62 }
  0xdb   :  { %v237_v1 = vxor.u32 2147483648, %v533_v63 }
  0xdc   :  { %v241_v7 = vsel %vm239_vm10, %v240_v0, %v533_v63  ;;  %v449_v4 = vsel %vm447_vm11, %v240_v0, %v533_v63 }
  0xdd   :  { %v238_v5 = vsel %vm236_vm12, %v531_v62, %v237_v1  ;;  %v446_v6 = vsel %vm444_vm13, %v531_v62, %v237_v1 }
  0xde   :  { %v242_v9 = vsel %vm235_vm14, %v238_v5, %v241_v7  ;;  %v450_v10 = vsel %vm443_vm15, %v446_v6, %v449_v4 }
  0xdf   :  { %v243_v11 = vsel %vm233_vm0, nan, %v242_v9  ;;  %v451_v13 = vsel %vm233_vm0, nan, %v450_v10 }
  0xe0   :  { %454 = vst.msk [vmem:[#allocation2 + $0x8] sm:$0xff] %vm452_vm3, %v243_v11  ;;  %456 = vst.msk [vmem:[#allocation4 + $0x8] sm:$0xff] %vm452_vm3, %v451_v13 }
  0xe1   :  { %545 = shalt.err (!%p542_p4)
}
  0xe2   :  { %s546_s23 = scalar_lea.hbm %s719_s2, 256 }
  0xe3   :  { %p547_p5 = scmp.ne.s32.totalorder %s719_s2, %s546_s23  ;;  %p550_p6 = scmp.lt.u32.totalorder %s546_s23, %s719_s2 }
  0xe5   :  { %p552_p7 = pnand %p550_p6, %p547_p5 }
  0xe7   :  { %555 = shalt.err (!%p552_p7)
}
  0xe8   :  { %s591_s28 = smov 128   ;;  %s592_s29 = smov 8  }
  0xe9   :  { %468 = dma.vmem_to_hbm [thread:$0]  %s463_s1, 256, %s719_s2, [#allocation3], %s591_s28, %s591_s28, %s592_s29  }
  0xea   :  { %s556_s5 = scalar_lea.vmem %s684_s19, 256  ;;  %p561_p9 = scmp.lt.s32.totalorder %s684_s19, %s684_s19 }
  0xeb   :  { %p557_p8 = scmp.ne.s32.totalorder %s684_s19, %s556_s5  ;;  %p562_p10 = scmp.lt.s32.totalorder %s556_s5, %s556_s5 }
  0xed   :  { %p563_p11 = por %p562_p10, %p561_p9 }
  0xef   :  { %p564_p12 = pnand %p563_p11, %p557_p8 }
  0xf1   :  { %567 = shalt.err (!%p564_p12)
}
  0xf2   :  { %s568_s8 = scalar_lea.hbm %s720_s3, 256 }
  0xf3   :  { %p569_p13 = scmp.ne.s32.totalorder %s720_s3, %s568_s8  ;;  %p572_p0 = scmp.lt.u32.totalorder %s568_s8, %s720_s3 }
  0xf5   :  { %p574_p1 = pnand %p572_p0, %p569_p13 }
  0xf7   :  { %577 = shalt.err (!%p574_p1)
}
  0xf8   :  { %480 = dma.vmem_to_hbm [thread:$0]  %s684_s19, 256, %s720_s3, [#allocation5], %s591_s28, %s591_s28, %s592_s29  }
  0xf9   :  { %578 = dma.done.wait [#allocation3], 256  }
  0xfa   :  { %579 = vsyncadd [#allocation3], 4294967040 }
  0xfb   :  { %580 = dma.done.wait [#allocation5], 256  }
  0xfc   :  { %581 = vsyncadd [#allocation5], 4294967040 }
  0xfd   :  { %487 = vsyncpa [#allocation3], 1 }
  0xfe   :  { %488 = vsyncpa [#allocation5], 1 }

</bundles_post_ra>
